<compile_context>
chip_gen: v5e
topology: v5e:2x2
jax: 0.10.0
libtpu: 0.0.40
codegen_flags: <defaults>
</compile_context>

<pallas_src>
import jax
import jax.numpy as jnp
from jax import lax
from jax.experimental import pallas as pl
from jax.experimental.pallas import tpu as pltpu

LN_EPS = 1e-5


def _perceiver_attn_kernel(q_ref, kv_ref, ln_w_ref, ln_b_ref,
                           wk_ref, bk_ref, wv_ref, bv_ref,
                           wo_ref, bo_ref, out_ref):
    # q_ref: (B_blk, S_q, D), kv_ref: (B_blk, S_kv, D) -- per-grid-step blocks.
    # Weights are whole-array VMEM refs in (K, N) layout, bf16; biases/LN f32.
    b_blk, s_q, d = q_ref.shape
    s_kv = kv_ref.shape[1]

    ln_w = ln_w_ref[...]          # (1, D) f32 -- read once, reused for q and kv
    ln_b = ln_b_ref[...]          # (1, D) f32

    def layernorm(x):             # x: (B_blk, S, D), computed in f32
        x = x.astype(jnp.float32)
        mu = jnp.mean(x, axis=-1, keepdims=True)
        xc = x - mu
        var = jnp.mean(xc * xc, axis=-1, keepdims=True)
        return xc * lax.rsqrt(var + LN_EPS) * ln_w + ln_b

    qn = layernorm(q_ref[...]).astype(jnp.bfloat16)     # (B_blk, S_q, D)
    kvn = layernorm(kv_ref[...]).astype(jnp.bfloat16)   # (B_blk, S_kv, D)

    # K / V projections: flatten (B_blk*S_kv, D) so the MXU rows fill.
    # wk/bk carry the 1/sqrt(D) attention scale pre-folded on the host.
    kv2 = kvn.reshape(b_blk * s_kv, d)
    k = (jnp.dot(kv2, wk_ref[...], preferred_element_type=jnp.float32)
         + bk_ref[...]).reshape(b_blk, s_kv, d)
    v = (jnp.dot(kv2, wv_ref[...], preferred_element_type=jnp.float32)
         + bv_ref[...]).reshape(b_blk, s_kv, d)

    # scores: batched contraction over D (transpose-free MXU form).
    s = lax.dot_general(qn, k.astype(jnp.bfloat16),
                        dimension_numbers=(((2,), (2,)), ((0,), (0,))),
                        preferred_element_type=jnp.float32)   # (B_blk, S_q, S_kv)

    # numerically-stable softmax in f32; reciprocal goes to the idle EUP.
    m = jnp.max(s, axis=-1, keepdims=True)
    p = jnp.exp(s - m)
    p = p * pl.reciprocal(jnp.sum(p, axis=-1, keepdims=True), approx=True)

    attn = lax.dot_general(p.astype(jnp.bfloat16), v.astype(jnp.bfloat16),
                           dimension_numbers=(((2,), (1,)), ((0,), (0,))),
                           preferred_element_type=jnp.float32)  # (B_blk, S_q, D)

    # to_out: flatten rows again so the final projection fills the MXU.
    out = (jnp.dot(attn.reshape(b_blk * s_q, d).astype(jnp.bfloat16),
                   wo_ref[...], preferred_element_type=jnp.float32)
           + bo_ref[...]).reshape(b_blk, s_q, d)
    out_ref[...] = out.astype(out_ref.dtype)


def perceiver_sdpa_attention(q, kv, params, *, batch_block=8):
    """q: (B, S_q, D) or (S_q, D); kv: (B, S_kv, D) or (S_kv, D)."""
    squeeze_batch = q.ndim == 2
    if squeeze_batch:
        q, kv = q[None], kv[None]
    B, S_q, D = q.shape
    _, S_kv, _ = kv.shape

    # --- batch blocking: fill MXU rows, but keep >=2 grid steps when B>1 so
    # both v7x TensorCores have work (batch axis is marked "parallel"). ---
    b_blk = min(B, batch_block)
    if B > 1 and pl.cdiv(B, b_blk) < 2:
        b_blk = pl.cdiv(B, 2)
    B_pad = pl.cdiv(B, b_blk) * b_blk
    if B_pad != B:
        q = jnp.concatenate(
            [q, jnp.zeros((B_pad - B, S_q, D), q.dtype)], axis=0)
        kv = jnp.concatenate(
            [kv, jnp.zeros((B_pad - B, S_kv, D), kv.dtype)], axis=0)
    n_steps = B_pad // b_blk

    # --- host-side layout plumbing (done once, outside the hot path) ---
    w_dtype = jnp.bfloat16                      # MXU operand dtype
    scale = 1.0 / float(D) ** 0.5
    wkv = params["wkv"].astype(jnp.float32)     # (2D, D)
    bkv = params["bkv"].astype(jnp.float32)     # (2D,)
    # Scale fold is applied in f32, THEN cast to bf16 (order matters for bf16).
    wk_t = (wkv[:D].T * scale).astype(w_dtype)  # (D, D)  K-proj, scale folded
    bk = (bkv[:D] * scale).reshape(1, D).astype(jnp.float32)
    wv_t = wkv[D:].T.astype(w_dtype)            # (D, D)
    bv = bkv[D:].reshape(1, D).astype(jnp.float32)
    wo_t = params["wo"].astype(jnp.float32).T.astype(w_dtype)   # (D, D)
    bo = params["bo"].reshape(1, D).astype(jnp.float32)
    ln_w = params["ln_w"].reshape(1, D).astype(jnp.float32)
    ln_b = params["ln_b"].reshape(1, D).astype(jnp.float32)

    # Constant operands: whole-array, single-copy, VMEM-resident for all steps.
    resident = pl.BlockSpec(memory_space=pltpu.MemorySpace.VMEM)

    itemsize = jnp.dtype(q.dtype).itemsize
    cost = pl.CostEstimate(
        flops=int(B_pad * (4 * S_kv * D * D          # K and V projections
                           + 4 * S_q * S_kv * D      # scores + attn*V
                           + 2 * S_q * D * D)),      # to_out
        transcendentals=int(B_pad * S_q * S_kv),     # exp in softmax
        bytes_accessed=int((B_pad * (2 * S_q + S_kv) * D) * itemsize
                           + 3 * D * D * 2 + 6 * D * 4),
    )

    out = pl.pallas_call(
        _perceiver_attn_kernel,
        out_shape=jax.ShapeDtypeStruct((B_pad, S_q, D), q.dtype),
        grid=(n_steps,),
        in_specs=[
            pl.BlockSpec((b_blk, S_q, D), lambda b: (b, 0, 0)),   # q  block
            pl.BlockSpec((b_blk, S_kv, D), lambda b: (b, 0, 0)),  # kv block
            resident,    # ln weight
            resident,    # ln bias
            resident,    # wk (K,N) bf16, scale pre-folded
            resident,    # bk f32, scale pre-folded
            resident,    # wv (K,N) bf16
            resident,    # bv f32
            resident,    # wo (K,N) bf16
            resident,    # bo f32
        ],
        out_specs=pl.BlockSpec((b_blk, S_q, D), lambda b: (b, 0, 0)),
        compiler_params=pltpu.CompilerParams(
            dimension_semantics=("parallel",),
            vmem_limit_bytes=48 * 1024 * 1024),   # fits v7x's 64 MiB VMEM
        cost_estimate=cost,
    )(q, kv, ln_w, ln_b, wk_t, bk, wv_t, bv, wo_t, bo)

    out = out[:B]
    return out[0] if squeeze_batch else out


def _reference(q, kv, params):
    D = q.shape[-1]

    def layernorm(x):
        mu = jnp.mean(x, axis=-1, keepdims=True)
        var = jnp.mean((x - mu) ** 2, axis=-1, keepdims=True)
        return (x - mu) / jnp.sqrt(var + LN_EPS) * params["ln_w"] + params["ln_b"]

    qn = layernorm(q)
    kvn = layernorm(kv)
    kvp = kvn @ params["wkv"].T + params["bkv"]
    k, v = kvp[..., :D], kvp[..., D:]
    s = jnp.einsum("...qd,...kd->...qk", qn, k) / jnp.sqrt(jnp.float32(D))
    p = jax.nn.softmax(s, axis=-1)
    return jnp.einsum("...qk,...kd->...qd", p, v) @ params["wo"].T + params["bo"]


if __name__ == "__main__":
    # Small but lane-dense shapes: D multiple of 128 keeps stores unmasked.
    B, S_q, S_kv, D = 2, 8, 16, 128
    key = jax.random.PRNGKey(0)
    keys = jax.random.split(key, 10)

    q = jax.random.normal(keys[0], (B, S_q, D), dtype=jnp.float32)
    kv = jax.random.normal(keys[1], (B, S_kv, D), dtype=jnp.float32)

    # Deterministic parameter init (shapes from __init__).
    params = {
        "ln_w": 1.0 + 0.1 * jax.random.normal(keys[7], (D,), jnp.float32),   # LayerNorm weight
        "ln_b": 0.1 * jax.random.normal(keys[8], (D,), jnp.float32),         # LayerNorm bias
        "wq": jax.random.normal(keys[2], (D, D), jnp.float32) * 0.02,        # to_q (unused in forward)
        "bq": jnp.zeros((D,), jnp.float32),                                  # to_q bias (unused)
        "wkv": jax.random.normal(keys[3], (2 * D, D), jnp.float32) * 0.02,   # to_kv weight
        "bkv": jax.random.normal(keys[4], (2 * D,), jnp.float32) * 0.02,     # to_kv bias
        "wo": jax.random.normal(keys[5], (D, D), jnp.float32) * 0.02,        # to_out weight
        "bo": jax.random.normal(keys[6], (D,), jnp.float32) * 0.02,          # to_out bias
    }

    out = jax.block_until_ready(perceiver_sdpa_attention(q, kv, params))
    ref = _reference(q, kv, params)
    assert out.shape == (B, S_q, D)
    # bf16 MXU operands + approx reciprocal -> tolerance looser than pure-f32.
    assert jnp.allclose(out, ref, atol=2e-2, rtol=2e-2), "mismatch vs. JAX reference"

    # Also exercise the unbatched (2-D) path, matching the module's literal signature.
    out2 = jax.block_until_ready(perceiver_sdpa_attention(q[0], kv[0], params))
    assert out2.shape == (S_q, D)
    assert jnp.allclose(out2, ref[0], atol=2e-2, rtol=2e-2), "mismatch (unbatched) vs. reference"

    print("KERNEL_OK")
</pallas_src>

<mosaic_0001>
module attributes {stable_mosaic.version = 11 : i64} {
  func.func @_perceiver_attn_kernel(%arg0: i32, %arg1: memref<1x8x128xf32, #tpu.memory_space<vmem>>, %arg2: memref<1x16x128xf32, #tpu.memory_space<vmem>>, %arg3: memref<1x128xf32, #tpu.memory_space<vmem>>, %arg4: memref<1x128xf32, #tpu.memory_space<vmem>>, %arg5: memref<128x128xbf16, #tpu.memory_space<vmem>>, %arg6: memref<1x128xf32, #tpu.memory_space<vmem>>, %arg7: memref<128x128xbf16, #tpu.memory_space<vmem>>, %arg8: memref<1x128xf32, #tpu.memory_space<vmem>>, %arg9: memref<128x128xbf16, #tpu.memory_space<vmem>>, %arg10: memref<1x128xf32, #tpu.memory_space<vmem>>, %arg11: memref<1x8x128xf32, #tpu.memory_space<vmem>>) attributes {dimension_semantics = [#tpu.dimension_semantics<parallel>], iteration_bounds = array<i64: 2>, scalar_prefetch = 0 : i64, scratch_operands = 0 : i64, tpu.core_type = #tpu.core_type<tc>, window_params = [{transform_indices = @transform_0, window_bounds = array<i64: 1, 8, 128>}, {transform_indices = @transform_1, window_bounds = array<i64: 1, 16, 128>}, {pipeline_mode = #tpu.pipeline_mode<synchronous>, transform_indices = @transform_2, window_bounds = array<i64: 1, 128>}, {pipeline_mode = #tpu.pipeline_mode<synchronous>, transform_indices = @transform_3, window_bounds = array<i64: 1, 128>}, {pipeline_mode = #tpu.pipeline_mode<synchronous>, transform_indices = @transform_4, window_bounds = array<i64: 128, 128>}, {pipeline_mode = #tpu.pipeline_mode<synchronous>, transform_indices = @transform_5, window_bounds = array<i64: 1, 128>}, {pipeline_mode = #tpu.pipeline_mode<synchronous>, transform_indices = @transform_6, window_bounds = array<i64: 128, 128>}, {pipeline_mode = #tpu.pipeline_mode<synchronous>, transform_indices = @transform_7, window_bounds = array<i64: 1, 128>}, {pipeline_mode = #tpu.pipeline_mode<synchronous>, transform_indices = @transform_8, window_bounds = array<i64: 128, 128>}, {pipeline_mode = #tpu.pipeline_mode<synchronous>, transform_indices = @transform_9, window_bounds = array<i64: 1, 128>}, {transform_indices = @transform_10, window_bounds = array<i64: 1, 8, 128>}]} {
    %c0 = arith.constant 0 : index
    %c0_0 = arith.constant 0 : index
    %0 = vector.load %arg3[%c0, %c0_0] : memref<1x128xf32, #tpu.memory_space<vmem>>, vector<1x128xf32>
    %c0_1 = arith.constant 0 : index
    %c0_2 = arith.constant 0 : index
    %1 = vector.load %arg4[%c0_1, %c0_2] : memref<1x128xf32, #tpu.memory_space<vmem>>, vector<1x128xf32>
    %c0_3 = arith.constant 0 : index
    %c0_4 = arith.constant 0 : index
    %c0_5 = arith.constant 0 : index
    %2 = vector.load %arg1[%c0_3, %c0_4, %c0_5] : memref<1x8x128xf32, #tpu.memory_space<vmem>>, vector<1x8x128xf32>
    %cst = arith.constant dense<0.000000e+00> : vector<1x8xf32>
    %3 = vector.multi_reduction <add>, %2, %cst [2] : vector<1x8x128xf32> to vector<1x8xf32>
    %4 = vector.shape_cast %3 : vector<1x8xf32> to vector<1x8x1xf32>
    %cst_6 = arith.constant 1.280000e+02 : f32
    %5 = vector.broadcast %cst_6 : f32 to vector<1x8x1xf32>
    %6 = arith.divf %4, %5 : vector<1x8x1xf32>
    %7 = vector.broadcast %6 : vector<1x8x1xf32> to vector<1x8x128xf32>
    %8 = arith.subf %2, %7 : vector<1x8x128xf32>
    %9 = arith.mulf %8, %8 : vector<1x8x128xf32>
    %cst_7 = arith.constant dense<0.000000e+00> : vector<1x8xf32>
    %10 = vector.multi_reduction <add>, %9, %cst_7 [2] : vector<1x8x128xf32> to vector<1x8xf32>
    %11 = vector.shape_cast %10 : vector<1x8xf32> to vector<1x8x1xf32>
    %cst_8 = arith.constant 1.280000e+02 : f32
    %12 = vector.broadcast %cst_8 : f32 to vector<1x8x1xf32>
    %13 = arith.divf %11, %12 : vector<1x8x1xf32>
    %cst_9 = arith.constant 9.99999974E-6 : f32
    %14 = vector.broadcast %cst_9 : f32 to vector<1x8x1xf32>
    %15 = arith.addf %13, %14 : vector<1x8x1xf32>
    %16 = math.rsqrt %15 : vector<1x8x1xf32>
    %17 = vector.broadcast %16 : vector<1x8x1xf32> to vector<1x8x128xf32>
    %18 = arith.mulf %8, %17 : vector<1x8x128xf32>
    %19 = vector.shape_cast %0 : vector<1x128xf32> to vector<1x1x128xf32>
    %20 = vector.broadcast %19 : vector<1x1x128xf32> to vector<1x8x128xf32>
    %21 = arith.mulf %18, %20 : vector<1x8x128xf32>
    %22 = vector.shape_cast %1 : vector<1x128xf32> to vector<1x1x128xf32>
    %23 = vector.broadcast %22 : vector<1x1x128xf32> to vector<1x8x128xf32>
    %24 = arith.addf %21, %23 : vector<1x8x128xf32>
    %25 = arith.truncf %24 : vector<1x8x128xf32> to vector<1x8x128xbf16>
    %c0_10 = arith.constant 0 : index
    %c0_11 = arith.constant 0 : index
    %c0_12 = arith.constant 0 : index
    %26 = vector.load %arg2[%c0_10, %c0_11, %c0_12] : memref<1x16x128xf32, #tpu.memory_space<vmem>>, vector<1x16x128xf32>
    %cst_13 = arith.constant dense<0.000000e+00> : vector<1x16xf32>
    %27 = vector.multi_reduction <add>, %26, %cst_13 [2] : vector<1x16x128xf32> to vector<1x16xf32>
    %28 = vector.shape_cast %27 : vector<1x16xf32> to vector<1x16x1xf32>
    %cst_14 = arith.constant 1.280000e+02 : f32
    %29 = vector.broadcast %cst_14 : f32 to vector<1x16x1xf32>
    %30 = arith.divf %28, %29 : vector<1x16x1xf32>
    %31 = vector.broadcast %30 : vector<1x16x1xf32> to vector<1x16x128xf32>
    %32 = arith.subf %26, %31 : vector<1x16x128xf32>
    %33 = arith.mulf %32, %32 : vector<1x16x128xf32>
    %cst_15 = arith.constant dense<0.000000e+00> : vector<1x16xf32>
    %34 = vector.multi_reduction <add>, %33, %cst_15 [2] : vector<1x16x128xf32> to vector<1x16xf32>
    %35 = vector.shape_cast %34 : vector<1x16xf32> to vector<1x16x1xf32>
    %cst_16 = arith.constant 1.280000e+02 : f32
    %36 = vector.broadcast %cst_16 : f32 to vector<1x16x1xf32>
    %37 = arith.divf %35, %36 : vector<1x16x1xf32>
    %cst_17 = arith.constant 9.99999974E-6 : f32
    %38 = vector.broadcast %cst_17 : f32 to vector<1x16x1xf32>
    %39 = arith.addf %37, %38 : vector<1x16x1xf32>
    %40 = math.rsqrt %39 : vector<1x16x1xf32>
    %41 = vector.broadcast %40 : vector<1x16x1xf32> to vector<1x16x128xf32>
    %42 = arith.mulf %32, %41 : vector<1x16x128xf32>
    %43 = vector.shape_cast %0 : vector<1x128xf32> to vector<1x1x128xf32>
    %44 = vector.broadcast %43 : vector<1x1x128xf32> to vector<1x16x128xf32>
    %45 = arith.mulf %42, %44 : vector<1x16x128xf32>
    %46 = vector.shape_cast %1 : vector<1x128xf32> to vector<1x1x128xf32>
    %47 = vector.broadcast %46 : vector<1x1x128xf32> to vector<1x16x128xf32>
    %48 = arith.addf %45, %47 : vector<1x16x128xf32>
    %49 = arith.truncf %48 : vector<1x16x128xf32> to vector<1x16x128xbf16>
    %50 = vector.shape_cast %49 : vector<1x16x128xbf16> to vector<16x128xbf16>
    %c0_18 = arith.constant 0 : index
    %c0_19 = arith.constant 0 : index
    %51 = vector.load %arg5[%c0_18, %c0_19] : memref<128x128xbf16, #tpu.memory_space<vmem>>, vector<128x128xbf16>
    %cst_20 = arith.constant dense<0.000000e+00> : vector<16x128xf32>
    %52 = tpu.matmul %50, %51, %cst_20 {dimension_numbers = #tpu.dot_dimension_numbers<[1], [0], [0], [1], [0, 0, 1, 1], [], []>} : vector<16x128xbf16>, vector<128x128xbf16>, vector<16x128xf32> -> vector<16x128xf32>
    %c0_21 = arith.constant 0 : index
    %c0_22 = arith.constant 0 : index
    %53 = vector.load %arg6[%c0_21, %c0_22] : memref<1x128xf32, #tpu.memory_space<vmem>>, vector<1x128xf32>
    %54 = vector.broadcast %53 : vector<1x128xf32> to vector<16x128xf32>
    %55 = arith.addf %52, %54 : vector<16x128xf32>
    %56 = vector.shape_cast %55 : vector<16x128xf32> to vector<1x16x128xf32>
    %c0_23 = arith.constant 0 : index
    %c0_24 = arith.constant 0 : index
    %57 = vector.load %arg7[%c0_23, %c0_24] : memref<128x128xbf16, #tpu.memory_space<vmem>>, vector<128x128xbf16>
    %cst_25 = arith.constant dense<0.000000e+00> : vector<16x128xf32>
    %58 = tpu.matmul %50, %57, %cst_25 {dimension_numbers = #tpu.dot_dimension_numbers<[1], [0], [0], [1], [0, 0, 1, 1], [], []>} : vector<16x128xbf16>, vector<128x128xbf16>, vector<16x128xf32> -> vector<16x128xf32>
    %c0_26 = arith.constant 0 : index
    %c0_27 = arith.constant 0 : index
    %59 = vector.load %arg8[%c0_26, %c0_27] : memref<1x128xf32, #tpu.memory_space<vmem>>, vector<1x128xf32>
    %60 = vector.broadcast %59 : vector<1x128xf32> to vector<16x128xf32>
    %61 = arith.addf %58, %60 : vector<16x128xf32>
    %62 = vector.shape_cast %61 : vector<16x128xf32> to vector<1x16x128xf32>
    %63 = arith.truncf %56 : vector<1x16x128xf32> to vector<1x16x128xbf16>
    %cst_28 = arith.constant dense<0.000000e+00> : vector<1x8x16xf32>
    %64 = tpu.matmul %25, %63, %cst_28 {dimension_numbers = #tpu.dot_dimension_numbers<[2], [2], [1], [1], [0, 0, 0, 1, 1, 1], [0], [0]>} : vector<1x8x128xbf16>, vector<1x16x128xbf16>, vector<1x8x16xf32> -> vector<1x8x16xf32>
    %cst_29 = arith.constant dense<0xFF800000> : vector<1x8xf32>
    %65 = vector.multi_reduction <maximumf>, %64, %cst_29 [2] : vector<1x8x16xf32> to vector<1x8xf32>
    %66 = vector.shape_cast %65 : vector<1x8xf32> to vector<1x8x1xf32>
    %67 = vector.broadcast %66 : vector<1x8x1xf32> to vector<1x8x16xf32>
    %68 = arith.subf %64, %67 : vector<1x8x16xf32>
    %69 = math.exp %68 : vector<1x8x16xf32>
    %cst_30 = arith.constant dense<0.000000e+00> : vector<1x8xf32>
    %70 = vector.multi_reduction <add>, %69, %cst_30 [2] : vector<1x8x16xf32> to vector<1x8xf32>
    %71 = vector.shape_cast %70 : vector<1x8xf32> to vector<1x8x1xf32>
    %72 = tpu.reciprocal %71 {approx = true} : vector<1x8x1xf32> -> vector<1x8x1xf32>
    %73 = vector.broadcast %72 : vector<1x8x1xf32> to vector<1x8x16xf32>
    %74 = arith.mulf %69, %73 : vector<1x8x16xf32>
    %75 = arith.truncf %74 : vector<1x8x16xf32> to vector<1x8x16xbf16>
    %76 = arith.truncf %62 : vector<1x16x128xf32> to vector<1x16x128xbf16>
    %cst_31 = arith.constant dense<0.000000e+00> : vector<1x8x128xf32>
    %77 = tpu.matmul %75, %76, %cst_31 {dimension_numbers = #tpu.dot_dimension_numbers<[2], [1], [1], [2], [0, 0, 0, 1, 1, 2], [0], [0]>} : vector<1x8x16xbf16>, vector<1x16x128xbf16>, vector<1x8x128xf32> -> vector<1x8x128xf32>
    %78 = vector.shape_cast %77 : vector<1x8x128xf32> to vector<8x128xf32>
    %79 = arith.truncf %78 : vector<8x128xf32> to vector<8x128xbf16>
    %c0_32 = arith.constant 0 : index
    %c0_33 = arith.constant 0 : index
    %80 = vector.load %arg9[%c0_32, %c0_33] : memref<128x128xbf16, #tpu.memory_space<vmem>>, vector<128x128xbf16>
    %cst_34 = arith.constant dense<0.000000e+00> : vector<8x128xf32>
    %81 = tpu.matmul %79, %80, %cst_34 {dimension_numbers = #tpu.dot_dimension_numbers<[1], [0], [0], [1], [0, 0, 1, 1], [], []>} : vector<8x128xbf16>, vector<128x128xbf16>, vector<8x128xf32> -> vector<8x128xf32>
    %c0_35 = arith.constant 0 : index
    %c0_36 = arith.constant 0 : index
    %82 = vector.load %arg10[%c0_35, %c0_36] : memref<1x128xf32, #tpu.memory_space<vmem>>, vector<1x128xf32>
    %83 = vector.broadcast %82 : vector<1x128xf32> to vector<8x128xf32>
    %84 = arith.addf %81, %83 : vector<8x128xf32>
    %85 = vector.shape_cast %84 : vector<8x128xf32> to vector<1x8x128xf32>
    %c0_37 = arith.constant 0 : index
    %c0_38 = arith.constant 0 : index
    %c0_39 = arith.constant 0 : index
    %86 = vector.load %arg11[%c0_37, %c0_38, %c0_39] : memref<1x8x128xf32, #tpu.memory_space<vmem>>, vector<1x8x128xf32>
    tpu.vector_store %arg11[%c0_37, %c0_38, %c0_39], %85 {strides = array<i32>} : memref<1x8x128xf32, #tpu.memory_space<vmem>>, vector<1x8x128xf32>,
    return
  }
  func.func @transform_0(%arg0: i32) -> (i32, i32, i32) {
    %c0_i32 = arith.constant 0 : i32
    %c0_i32_0 = arith.constant 0 : i32
    %c0_i32_1 = arith.constant 0 : i32
    return %arg0, %c0_i32, %c0_i32_0 : i32, i32, i32
  }
  func.func @transform_1(%arg0: i32) -> (i32, i32, i32) {
    %c0_i32 = arith.constant 0 : i32
    %c0_i32_0 = arith.constant 0 : i32
    %c0_i32_1 = arith.constant 0 : i32
    return %arg0, %c0_i32, %c0_i32_0 : i32, i32, i32
  }
  func.func @transform_2(%arg0: i32) -> (i32, i32) {
    %c0_i32 = arith.constant 0 : i32
    %c0_i32_0 = arith.constant 0 : i32
    %c0_i32_1 = arith.constant 0 : i32
    return %c0_i32, %c0_i32_0 : i32, i32
  }
  func.func @transform_3(%arg0: i32) -> (i32, i32) {
    %c0_i32 = arith.constant 0 : i32
    %c0_i32_0 = arith.constant 0 : i32
    %c0_i32_1 = arith.constant 0 : i32
    return %c0_i32, %c0_i32_0 : i32, i32
  }
  func.func @transform_4(%arg0: i32) -> (i32, i32) {
    %c0_i32 = arith.constant 0 : i32
    %c0_i32_0 = arith.constant 0 : i32
    %c0_i32_1 = arith.constant 0 : i32
    return %c0_i32, %c0_i32_0 : i32, i32
  }
  func.func @transform_5(%arg0: i32) -> (i32, i32) {
    %c0_i32 = arith.constant 0 : i32
    %c0_i32_0 = arith.constant 0 : i32
    %c0_i32_1 = arith.constant 0 : i32
    return %c0_i32, %c0_i32_0 : i32, i32
  }
  func.func @transform_6(%arg0: i32) -> (i32, i32) {
    %c0_i32 = arith.constant 0 : i32
    %c0_i32_0 = arith.constant 0 : i32
    %c0_i32_1 = arith.constant 0 : i32
    return %c0_i32, %c0_i32_0 : i32, i32
  }
  func.func @transform_7(%arg0: i32) -> (i32, i32) {
    %c0_i32 = arith.constant 0 : i32
    %c0_i32_0 = arith.constant 0 : i32
    %c0_i32_1 = arith.constant 0 : i32
    return %c0_i32, %c0_i32_0 : i32, i32
  }
  func.func @transform_8(%arg0: i32) -> (i32, i32) {
    %c0_i32 = arith.constant 0 : i32
    %c0_i32_0 = arith.constant 0 : i32
    %c0_i32_1 = arith.constant 0 : i32
    return %c0_i32, %c0_i32_0 : i32, i32
  }
  func.func @transform_9(%arg0: i32) -> (i32, i32) {
    %c0_i32 = arith.constant 0 : i32
    %c0_i32_0 = arith.constant 0 : i32
    %c0_i32_1 = arith.constant 0 : i32
    return %c0_i32, %c0_i32_0 : i32, i32
  }
  func.func @transform_10(%arg0: i32) -> (i32, i32, i32) {
    %c0_i32 = arith.constant 0 : i32
    %c0_i32_0 = arith.constant 0 : i32
    %c0_i32_1 = arith.constant 0 : i32
    return %arg0, %c0_i32, %c0_i32_0 : i32, i32, i32
  }
}

</mosaic_0001>

<bundles_post_ra>
// kernel: tpu_custom_call.1
= control target key start
LH: loop header
LB: loop body
LE: loop exit
PB: predicated region body
PF: predicated region fallthrough
CT: control target
= control target key end

     0   :  { %s1774_s0 = inlined_call_operand.hbm [shape: f32[2,8,128], index: 0, kind: input, shape index: {}]   ;;  %s1775_s1 = inlined_call_operand.hbm [shape: f32[2,16,128], index: 1, kind: input, shape index: {}]   ;;  %s1776_s2 = inlined_call_operand.vmem [shape: f32[1,128], index: 2, kind: input, shape index: {}]   ;;  %s1777_s3 = inlined_call_operand.vmem [shape: f32[1,128], index: 3, kind: input, shape index: {}]   ;;  %s1778_s4 = inlined_call_operand.hbm [shape: bf16[128,128], index: 4, kind: input, shape index: {}]   ;;  %s1779_s5 = inlined_call_operand.vmem [shape: f32[1,128], index: 5, kind: input, shape index: {}]   ;;  %s1780_s6 = inlined_call_operand.hbm [shape: bf16[128,128], index: 6, kind: input, shape index: {}]   ;;  %s1781_s7 = inlined_call_operand.vmem [shape: f32[1,128], index: 7, kind: input, shape index: {}]   ;;  %s1782_s8 = inlined_call_operand.hbm [shape: bf16[128,128], index: 8, kind: input, shape index: {}]   ;;  %s1783_s9 = inlined_call_operand.vmem [shape: f32[1,128], index: 9, kind: input, shape index: {}]   ;;  %s1784_s10 = inlined_call_operand.hbm [shape: f32[2,8,128], index: 10, kind: output, shape index: {}]  }
   0x1   :  { %1790 = sst [smem:[#allocation22_spill]] %s1778_s4 }
   0x2   :  { %1791 = sst [smem:[#allocation23_spill]] %s1780_s6 }
   0x3   :  { %1792 = sst [smem:[#allocation24_spill]] %s1782_s8 }
   0x4   :  { %15 = vsyncpa [#allocation3], 0 }
   0x5   :  { %17 = vsyncpa [#allocation3 + $0x1], 0 }
   0x6   :  { %18 = vsyncpa [#allocation6], 0 }
   0x7   :  { %20 = vsyncpa [#allocation6 + $0x1], 0 }
   0x8   :  { %21 = vsyncpa [#allocation9], 0 }
   0x9   :  { %22 = vsyncpa [#allocation4], 0 }
   0xa   :  { %24 = vsyncpa [#allocation4 + $0x1], 0  ;;  %s1545_s13 = smov 0   ;;  %s1547_s14 = smov 0  }
   0xb   :  { %s1549_s15 = smov 0   ;;  %s1551_s16 = smov 0  }
   0xc LB: > { %1793 = sst [smem:[#allocation17_spill]] %s1468_s13  ;;  %s1569_s20 = sadd.s32 4294967295, %s1480_s16   ;;  %s1480_s16 = sphi %s1551_s16, %s1811_s16   ;;  %s1476_s15 = sphi %s1549_s15, %s1813_s15   ;;  %s1472_s14 = sphi %s1547_s14, %s1815_s14   ;;  %s1468_s13 = sphi %s1545_s13, %s1814_s13  }
   0xd   : > { %1794 = sst [smem:[#allocation18_spill]] %s1476_s15  ;;  %p1005_p0 = scmp.ge.s32.totalorder %s1480_s16, 1 }
   0xe   : > { %s1795_s4 = sld [smem:[#allocation22_spill]]  ;;  %p51_p1 = scmp.eq.s32.totalorder %s1569_s20, 0 }
   0xf   : > { %p281_p2 = scmp.lt.s32.totalorder %s1480_s16, 3  ;;  %s1482_s22 = smov [#allocation7]  }
  0x10   : > { %s300_s23 = sshll.u32 %s1482_s22, 4  ;;  %s1797_s6 = sld [smem:[#allocation23_spill]]  ;;  %s301_s23 = int_to_ptr.vmem [resolvable:$true] %s300_s23 }
  0x11   : > { %p1574_p3 = pnand %p1005_p0, %p281_p2  ;;  %s1799_s8 = sld [smem:[#allocation24_spill]] }
  0x12   : > { %s1483_s11 = smov [#allocation8]   ;;  %s1484_s17 = smov 64  }
  0x13   : > { %p1166_p4 = pneg %p1574_p3  ;;  %s317_s12 = sshll.u32 %s1483_s11, 4  ;;  %s318_s12 = int_to_ptr.vmem [resolvable:$true] %s317_s12 }
  0x14   : > { %s298_s19 = sshll.u32 %s1795_s4, 4  ;;  %s1485_s18 = smov 4   ;;  %s299_s19 = int_to_ptr.hbm [resolvable:$true] %s298_s19 }
  0x15   : > { %p1586_p6 = pnand %p1166_p4, %p51_p1  ;;  %s1486_s22 = smov [#allocation10]  }
  0x16   : > { %s315_s26 = sshll.u32 %s1797_s6, 4  ;;  %s334_s24 = sshll.u32 %s1486_s22, 4  ;;  %s316_s26 = int_to_ptr.hbm [resolvable:$true] %s315_s26  ;;  %s335_s24 = int_to_ptr.vmem [resolvable:$true] %s334_s24 }
  0x17   : > { %s332_s30 = sshll.u32 %s1799_s8, 4  ;;  %s1004_s25 = sadd.s32 4294967294, %s1480_s16   ;;  %s333_s30 = int_to_ptr.hbm [resolvable:$true] %s332_s30 }
  0x18   : > { %1169 = dma.hbm_to_vmem [thread:$0]  (!%p1586_p6), %s299_s19, 1024, %s301_s23, [#allocation6], %s1484_s17, %s1484_s17, %s1485_s18  }
  0x19   : > { %1172 = dma.hbm_to_vmem [thread:$0]  (!%p1586_p6), %s316_s26, 1024, %s318_s12, [#allocation9], %s1484_s17, %s1484_s17, %s1485_s18  }
  0x1a   : > { %1175 = dma.hbm_to_vmem [thread:$0]  (!%p1586_p6), %s333_s30, 1024, %s335_s24, [#allocation9], %s1484_s17, %s1484_s17, %s1485_s18  }
  0x1b   : > { %s1601_s28 = sadd.s32 1, %s1480_s16   ;;  %s37_s29 = sadd.s32 1, %s1476_s15 }
  0x1c   : > { %1800 = sst [smem:[#allocation19_spill]] %s1601_s28  ;;  %s34_s19 = ssub.s32 %s1480_s16, %s1601_s28 }
  0x1d   : > { %p44_p7 = scmp.ne.s32.totalorder %s1476_s15, %s1472_s14  ;;  %p35_p8 = scmp.eq.s32.totalorder %s34_s19, 0 }
  0x1e   : > { %p45_p9 = scmp.eq.s32.totalorder %s1480_s16, 0  ;;  %p50_p10 = scmp.ne.s32.totalorder %s1472_s14, %s1468_s13 }
  0x1f   : > { %p268_p11 = scmp.eq.s32.totalorder %s1569_s20, 1  ;;  %p274_p2 = scmp.eq.s32.totalorder %s1004_s25, 1 }
  0x20   : > { %s1613_s23 = scalar_select %p35_p8, %s1476_s15, %s37_s29  }
  0x21   : > { %p1615_p12 = por %p45_p9, %p44_p7  ;;  %p1621_p13 = por %p51_p1, %p50_p10 }
  0x22   : > { %1801 = sst [smem:[#allocation20_spill]] %s1613_s23  ;;  %p1625_p0 = por %p268_p11, %p44_p7 }
  0x23   : > { %p1190_p4 = scmp.lt.s32.totalorder %s1480_s16, 2  ;;  %s1631_s11 = sand.u32 1, %s1476_s15  }
  0x24   : > { %p1633_p6 = por %p274_p2, %p50_p10  ;;  %s1010_s17 = sshll.u32 %s1631_s11, 3 }
  0x25   : > { %s1011_s18 = sshll.u32 %s1480_s16, 3  ;;  %s355_s4 = scalar_lea.vmem [#allocation2], %s1010_s17 }
  0x26   : > { %s1805_s12 = scalar_select %p1633_p6, 1, 0 }
  0x27   : > { %s359_s29 = scalar_lea.hbm %s1774_s0, %s1011_s18  ;;  %s363_s6 = sshll.u32 %s355_s4, 4  ;;  %s364_s6 = int_to_ptr.vmem [resolvable:$true] %s363_s6 }
  0x28   : > { %1806 = sst [smem:[#allocation21_spill]] %s1805_s12  ;;  %s361_s19 = sshll.u32 %s359_s29, 4  ;;  %s362_s19 = int_to_ptr.hbm [resolvable:$true] %s361_s19 }
  0x29   : > { %p1644_p7 = pnand %p1190_p4, %p1615_p12  ;;  %s1012_s8 = sshll.u32 %s1631_s11, 4 }
  0x2a   : > { %s370_s23 = sand.u32 1, %s1480_s16   ;;  %s374_s15 = scalar_lea.vmem [#allocation5], %s1012_s8 }
  0x2b   : > { %s382_s28 = sshll.u32 %s374_s15, 4  ;;  %s352_s12 = scalar_lea.sflag [#allocation3], %s1631_s11  ;;  %s383_s28 = int_to_ptr.vmem [resolvable:$true] %s382_s28 }
  0x2c   : > { %s1342_s13 = sshra.s32 %s362_s19, 4  ;;  %p1346_p9 = pneg %p1644_p7  ;;  %s1343_s13 = int_to_ptr.hbm [resolvable:$true] %s1342_s13 }
  0x2d   : > { %s1344_s18 = scalar_lea.hbm %s1343_s13, 8  ;;  %s1349_s17 = scalar_lea.hbm %s1774_s0, 16 }
  0x2e   : > { %p1345_p8 = scmp.ne.s32.totalorder %s1343_s13, %s1344_s18  ;;  %p1350_p12 = scmp.lt.s32.totalorder %s1343_s13, %s1774_s0 }
  0x2f   : > { %p1351_p2 = scmp.lt.s32.totalorder %s1349_s17, %s1344_s18 }
  0x30   : > { %p1347_p10 = pnand %p1346_p9, %p1345_p8 }
  0x31   : > { %p1352_p4 = por %p1351_p2, %p1350_p12 }
  0x32   : > { %p1348_p11 = pneg %p1347_p10 }
  0x34   : > { %p1353_p5 = pnand %p1352_p4, %p1348_p11 }
  0x36   : > { %1356 = shalt.err (!%p1353_p5)
}
  0x37   : > { %1179 = dma.hbm_to_vmem [thread:$0]  (!%p1644_p7), %s362_s19, 128, %s364_s6, %s352_s12  }
  0x38   : > { %s1123_s8 = sshll.u32 %s1480_s16, 4  ;;  %s371_s26 = scalar_lea.sflag [#allocation6], %s370_s23 }
  0x39   : > { %s379_s29 = scalar_lea.hbm %s1775_s1, %s1123_s8  ;;  %s1379_s6 = scalar_lea.hbm %s1775_s1, 32 }
  0x3a   : > { %s380_s4 = sshll.u32 %s379_s29, 4  ;;  %s381_s4 = int_to_ptr.hbm [resolvable:$true] %s380_s4 }
  0x3b   : > { %s1372_s22 = sshra.s32 %s381_s4, 4  ;;  %s1373_s22 = int_to_ptr.hbm [resolvable:$true] %s1372_s22 }
  0x3c   : > { %s1374_s13 = scalar_lea.hbm %s1373_s22, 16  ;;  %p1380_p11 = scmp.lt.s32.totalorder %s1373_s22, %s1775_s1 }
  0x3d   : > { %p1375_p8 = scmp.ne.s32.totalorder %s1373_s22, %s1374_s13  ;;  %p1381_p12 = scmp.lt.s32.totalorder %s1379_s6, %s1374_s13 }
  0x3f   : > { %p1377_p5 = pnand %p1375_p8, %p1346_p9  ;;  %p1382_p2 = por %p1381_p12, %p1380_p11 }
  0x41   : > { %p1378_p10 = pneg %p1377_p5 }
  0x43   : > { %p1383_p4 = pnand %p1382_p2, %p1378_p10 }
  0x45   : > { %1386 = shalt.err (!%p1383_p4)
}
  0x46   : > { %s1487_s23 = smov 128   ;;  %s1488_s24 = smov 8  }
  0x47   : > { %1182 = dma.hbm_to_vmem [thread:$0]  (!%p1644_p7), %s381_s4, 256, %s383_s28, %s371_s26, %s1487_s23, %s1487_s23, %s1488_s24  }
  0x48   : > { %394 = sbr.rel (%p1574_p3) target bundleno = 1177 (0x499), region = 60  ;;  %s1682_s8 = sand.u32 (!%p1574_p3), 1, %s1472_s14  }
  0x49   : > { %s1016_s15 = sshll.u32 (!%p1574_p3), %s1682_s8, 3  ;;  %s397_s11 = scalar_lea.sflag (!%p1574_p3), [#allocation3], %s1682_s8 }
  0x4a   : > { %s400_s29 = scalar_lea.vmem (!%p1574_p3), [#allocation2], %s1016_s15 }
  0x4d   : > { %1447 = dma.done.wait (%p1621_p13), %s397_s11, 128  }
  0x4e   : > { %1449 = vsyncadd (%p1621_p13), %s397_s11, 4294967168  ;;  %s406_s21 = sand.u32 1, %s1569_s20   ;;  %s1017_s28 = sshll.u32 %s1682_s8, 4 }
  0x4f   : > { %s407_s25 = scalar_lea.sflag [#allocation6], %s406_s21  ;;  %s410_s4 = scalar_lea.vmem [#allocation5], %s1017_s28 }
  0x50   : > { %1451 = dma.done.wait (%p1621_p13), %s407_s25, 256  }
  0x51   : > { %1453 = vsyncadd (%p1621_p13), %s407_s25, 4294967040 }
  0x52   : > { %1455 = dma.done.wait (%p51_p1), [#allocation6], 1024  }
  0x53   : > { %1457 = vsyncadd (%p51_p1), [#allocation6], 4294966272 }
  0x54   : > { %1459 = dma.done.wait (%p51_p1), [#allocation9], 2048  }
  0x55   : > { %1461 = vsyncadd (%p51_p1), [#allocation9], 4294965248  ;;  %v508_v0 = vld [vmem:[%s410_s4] sm:$0xff]  ;;  %v471_v1 = vld [vmem:[%s400_s29] sm:$0xff]  ;;  %v1489_v3 = vmov 128.0   ;;  %vm747_vm10 = vcmask 130048  }
  0x56   : > { %510 = vadd.xlane.f32.xlu0 %v508_v0  ;;  %472 = vadd.xlane.f32.xlu2 %v471_v1  ;;  %v509_v2 = vld [vmem:[%s410_s4 + $0x8] sm:$0xff]  ;;  %1240 = vrcp.f32 %v1489_v3  ;;  %v1130_v24 = vld [vmem:[#allocation7 + $0x30] sm:$0xff]  ;;  %v1128_v28 = vld [vmem:[#allocation7 + $0x20] sm:$0xff]  ;;  %s1120_s19 = sshll.u32 %s1569_s20, 3  ;;  %s467_s28 = scalar_lea.vmem [#allocation11], %s1016_s15 }
  0x57   : > { %v1131_v22 = vld [vmem:[#allocation7 + $0x38] sm:$0xff]  ;;  %v1138_v25 = vld [vmem:[#allocation8 + $0x30] sm:$0xff]  ;;  %v1129_v26 = vld [vmem:[#allocation7 + $0x28] sm:$0xff]  ;;  %s878_s11 = scalar_lea.hbm %s1784_s10, %s1120_s19  ;;  %s880_s25 = sshll.u32 %s467_s28, 4  ;;  %s881_s25 = int_to_ptr.vmem [resolvable:$true] %s880_s25 }
  0x58   : > { %v1139_v23 = vld [vmem:[#allocation8 + $0x38] sm:$0xff]  ;;  %630 = vmatpush.bf16.msra.mxu0 %v1131_v22  ;;  %v1137_v27 = vld [vmem:[#allocation8 + $0x28] sm:$0xff]  ;;  %v1136_v29 = vld [vmem:[#allocation8 + $0x20] sm:$0xff]  ;;  %s882_s4 = sshll.u32 %s878_s11, 4  ;;  %s868_s27 = scalar_lea.sflag [#allocation4], %s1682_s8  ;;  %s883_s4 = int_to_ptr.hbm [resolvable:$true] %s882_s4 }
  0x59   : > { %712 = vmatpush.bf16.msra.mxu1 %v1139_v23  ;;  %v1127_v30 = vld [vmem:[#allocation7 + $0x18] sm:$0xff]  ;;  %v1126_v32 = vld [vmem:[#allocation7 + $0x10] sm:$0xff]  ;;  %v1125_v36 = vld [vmem:[#allocation7 + $0x8] sm:$0xff]  ;;  %s1416_s20 = sshra.s32 %s883_s4, 4  ;;  %s1422_s18 = scalar_lea.hbm %s1784_s10, 16  ;;  %s1417_s20 = int_to_ptr.hbm [resolvable:$true] %s1416_s20 }
  0x5a   : > { %v1135_v31 = vld [vmem:[#allocation8 + $0x18] sm:$0xff]  ;;  %v1134_v33 = vld [vmem:[#allocation8 + $0x10] sm:$0xff]  ;;  %v1133_v37 = vld [vmem:[#allocation8 + $0x8] sm:$0xff]  ;;  %s1418_s26 = scalar_lea.hbm %s1417_s20, 8  ;;  %p1423_p7 = scmp.lt.s32.totalorder %s1417_s20, %s1784_s10 }
  0x5b   : > { %v1124_v42 = vld [vmem:[#allocation7] sm:$0xff]  ;;  %v1235_v63 = vld [vmem:[%s1776_s2] ss:$0 sm:$0xff]  ;;  %p1419_p1 = scmp.ne.s32.totalorder %s1417_s20, %s1418_s26  ;;  %p1424_p9 = scmp.lt.s32.totalorder %s1422_s18, %s1418_s26 }
  0x5c   : > { %v1241_v4 = vpop.eup %1240  ;;  %631 = vmatpush.bf16.msra.mxu0 %v1130_v24  ;;  %v1132_v43 = vld [vmem:[#allocation8] sm:$0xff]  ;;  %v1237_v23 = vld [vmem:[%s1779_s5] ss:$0 sm:$0xff] }
  0x5d   : > { %v475_v5 = vmul.f32 128.0, %v1241_v4  ;;  %vm479_vm0 = vweird.f32 %v1241_v4  ;;  %713 = vmatpush.bf16.msra.mxu1 %v1138_v25  ;;  %p1420_p3 = pnand %p1419_p1, %p1625_p0  ;;  %p1425_p8 = por %p1424_p9, %p1423_p7 }
  0x5e   : > { %512 = vadd.xlane.f32.xlu0 %v509_v2 }
  0x5f   : > { %v476_v6 = vsub.f32 1.0, %v475_v5  ;;  %v1236_v5 = vld [vmem:[%s1777_s3] ss:$0 sm:$0xff]  ;;  %p1421_p13 = pneg %p1420_p3 }
  0x60   : > { %632 = vmatpush.bf16.msra.mxu0 %v1129_v26 }
  0x61   : > { %v477_v7 = vmul.f32 %v1241_v4, %v476_v6  ;;  %714 = vmatpush.bf16.msra.mxu1 %v1137_v27  ;;  %p1426_p5 = pnand %p1425_p8, %p1421_p13 }
  0x63   : > { %v478_v8 = vadd.f32 %v1241_v4, %v477_v7 }
  0x64   : > { %633 = vmatpush.bf16.msra.mxu0 %v1128_v28 }
  0x65   : > { %v480_v9 = vsel %vm479_vm0, %v1241_v4, %v478_v8  ;;  %715 = vmatpush.bf16.msra.mxu1 %v1136_v29 }
  0x68   : > { %634 = vmatpush.bf16.msra.mxu0 %v1127_v30 }
  0x69   : > { %716 = vmatpush.bf16.msra.mxu1 %v1135_v31 }
  0x6c   : > { %635 = vmatpush.bf16.msra.mxu0 %v1126_v32 }
  0x6d   : > { %717 = vmatpush.bf16.msra.mxu1 %v1134_v33 }
  0x70   : > { %636 = vmatpush.bf16.msra.mxu0 %v1125_v36 }
  0x71   : > { %718 = vmatpush.bf16.msra.mxu1 %v1133_v37 }
  0x74   : > { %637 = vmatpush.bf16.msra.mxu0 %v1124_v42 }
  0x75   : > { %719 = vmatpush.bf16.msra.mxu1 %v1132_v43 }
  0xc9   : > { %v511_v10 = vpop.xlane.xlu0 %510  ;;  %v473_v11 = vpop.xlane.xlu2 %472 }
  0xca   : > { %v514_v12 = vmul.f32 %v511_v10, %v480_v9  ;;  %v481_v13 = vmul.f32 %v480_v9, %v473_v11 }
  0xcc   : > { %v1706_v14 = vsub.f32 %v508_v0, %v514_v12  ;;  %v1708_v15 = vsub.f32 %v471_v1, %v481_v13 }
  0xce   : > { %v518_v16 = vmul.f32 %v1706_v14, %v1706_v14  ;;  %v483_v17 = vmul.f32 %v1708_v15, %v1708_v15 }
  0xd0   : > { %520 = vadd.xlane.f32.xlu1 %v518_v16  ;;  %484 = vadd.xlane.f32.xlu2 %v483_v17 }
  0xd1   : > { %v513_v18 = vpop.xlane.xlu0 %512 }
  0xd2   : > { %v515_v19 = vmul.f32 %v513_v18, %v480_v9 }
  0xd4   : > { %v1714_v20 = vsub.f32 %v509_v2, %v515_v19 }
  0xd6   : > { %v519_v21 = vmul.f32 %v1714_v20, %v1714_v20 }
  0xd8   : > { %522 = vadd.xlane.f32.xlu1 %v519_v21 }
 0x143   : > { %v521_v34 = vpop.xlane.xlu1 %520  ;;  %v485_v35 = vpop.xlane.xlu2 %484 }
 0x144   : > { %v524_v38 = vmul.f32 %v521_v34, %v480_v9  ;;  %v486_v39 = vmul.f32 %v485_v35, %v480_v9 }
 0x146   : > { %v526_v40 = vadd.f32 1e-05, %v524_v38  ;;  %v487_v41 = vadd.f32 1e-05, %v486_v39 }
 0x148   : > { %1242 = vrsqrt.f32 %v526_v40  ;;  %vm494_vm1 = vweird.f32 %v487_v41  ;;  %vm534_vm4 = vweird.f32 %v526_v40 }
 0x149   : > { %1244 = vrsqrt.f32 %v487_v41 }
 0x14b   : > { %v523_v44 = vpop.xlane.xlu1 %522 }
 0x14c   : > { %v525_v45 = vmul.f32 %v523_v44, %v480_v9 }
 0x14e   : > { %v1243_v46 = vpop.eup %1242  ;;  %v527_v47 = vadd.f32 1e-05, %v525_v45 }
 0x14f   : > { %v1245_v48 = vpop.eup %1244  ;;  %v529_v49 = vmul.f32 %v1243_v46, %v526_v40  ;;  %vm535_vm3 = vweird.f32 %v1243_v46 }
 0x150   : > { %1246 = vrsqrt.f32 %v527_v47  ;;  %v489_v50 = vmul.f32 %v1245_v48, %v487_v41  ;;  %vm495_vm2 = vweird.f32 %v1245_v48  ;;  %vm536_vm6 = vmor %vm534_vm4, %vm535_vm3  ;;  %vm544_vm8 = vweird.f32 %v527_v47 }
 0x151   : > { %v530_v51 = vmul.f32 %v1243_v46, %v529_v49  ;;  %vm496_vm5 = vmor %vm494_vm1, %vm495_vm2  ;;  %v1147_v49 = vld [vmem:[#allocation10 + $0x38] sm:$0xff] }
 0x152   : > { %v490_v52 = vmul.f32 %v1245_v48, %v489_v50  ;;  %853 = vmatpush.bf16.msra.mxu3 %v1147_v49  ;;  %v1146_v50 = vld [vmem:[#allocation10 + $0x30] sm:$0xff] }
 0x153   : > { %v531_v53 = vmul.f32 0.5, %v530_v51  ;;  %v1145_v51 = vld [vmem:[#allocation10 + $0x28] sm:$0xff] }
 0x154   : > { %v491_v54 = vmul.f32 0.5, %v490_v52  ;;  %v1144_v52 = vld [vmem:[#allocation10 + $0x20] sm:$0xff] }
 0x155   : > { %v532_v55 = vsub.f32 1.5, %v531_v53  ;;  %v1143_v53 = vld [vmem:[#allocation10 + $0x18] sm:$0xff] }
 0x156   : > { %v1247_v56 = vpop.eup %1246  ;;  %v492_v57 = vsub.f32 1.5, %v491_v54  ;;  %854 = vmatpush.bf16.msra.mxu3 %v1146_v50  ;;  %v1142_v54 = vld [vmem:[#allocation10 + $0x10] sm:$0xff] }
 0x157   : > { %v533_v58 = vmul.f32 %v1243_v46, %v532_v55  ;;  %v539_v59 = vmul.f32 %v1247_v56, %v527_v47  ;;  %vm545_vm7 = vweird.f32 %v1247_v56 }
 0x158   : > { %v493_v60 = vmul.f32 %v1245_v48, %v492_v57  ;;  %vm546_vm9 = vmor %vm544_vm8, %vm545_vm7 }
 0x159   : > { %v537_v61 = vsel %vm536_vm6, %v1243_v46, %v533_v58  ;;  %v540_v62 = vmul.f32 %v1247_v56, %v539_v59 }
 0x15a   : > { %v548_v0 = vmul.f32 %v537_v61, %v1706_v14  ;;  %v497_v1 = vsel %vm496_vm5, %v1245_v48, %v493_v60  ;;  %855 = vmatpush.bf16.msra.mxu3 %v1145_v51  ;;  %v1140_v60 = vld [vmem:[#allocation10] sm:$0xff] }
 0x15b   : > { %v541_v2 = vmul.f32 0.5, %v540_v62  ;;  %v498_v3 = vmul.f32 %v497_v1, %v1708_v15 }
 0x15c   : > { %v550_v7 = vmul.f32 %v1235_v63, %v548_v0  ;;  %v1239_v0 = vld [vmem:[%s1783_s9] ss:$0 sm:$0xff] }
 0x15d   : > { %v542_v4 = vsub.f32 1.5, %v541_v2  ;;  %v502_v6 = vmul.f32 %v1235_v63, %v498_v3 }
 0x15e   : > { %v552_v12 = vadd.f32 %v1236_v5, %v550_v7  ;;  %856 = vmatpush.bf16.msra.mxu3 %v1144_v52 }
 0x15f   : > { %v543_v8 = vmul.f32 %v1247_v56, %v542_v4  ;;  %v506_v9 = vadd.f32 %v1236_v5, %v502_v6 }
 0x160   : > { %v554_v16 = vpack.c.bf16 %v552_v12, %v552_v12 }
 0x161   : > { %v547_v10 = vsel %vm546_vm9, %v1247_v56, %v543_v8  ;;  %v507_v40 = vpack.c.bf16 %v506_v9, %v506_v9  ;;  %v1141_v56 = vld [vmem:[#allocation10 + $0x8] sm:$0xff] }
 0x162   : > { %v549_v11 = vmul.f32 %v547_v10, %v1714_v20  ;;  %v578_v17 = vunpack.c.l.b16 %v554_v16  ;;  %v1238_v20 = vld [vmem:[%s1781_s7] ss:$0 sm:$0xff]  ;;  %857 = vmatpush.bf16.msra.mxu3 %v1143_v53 }
 0x164   : > { %v551_v13 = vmul.f32 %v1235_v63, %v549_v11 }
 0x166   : > { %v553_v14 = vadd.f32 %v1236_v5, %v551_v13  ;;  %858 = vmatpush.bf16.msra.mxu3 %v1142_v54 }
 0x168   : > { %v555_v15 = vpack.c.bf16 %v553_v14, %v553_v14 }
 0x16a   : > { %v579_v18 = vunpack.c.l.b16 %v555_v15  ;;  %859 = vmatpush.bf16.msra.mxu3 %v1141_v56 }
 0x16c   : > { %v580_v19 = vpack.c.b16 %v579_v18, %v578_v17 }
 0x16e   : > { %638 = vmatmul.bf16.vlgmr.msra.gmra.mxu0 %v580_v19  ;;  %720 = vmatmul.bf16.vlgmr.msra.gmra.mxu1 %v580_v19 }
 0x16f   : > { %860 = vmatpush.bf16.msra.mxu3 %v1140_v60 }
 0x1eb   : > { %v639_v21 = vpop.f32.mrf.mxu0  ;;  %v721_v22 = vpop.f32.mrf.mxu1 }
 0x1ec   : > { %v640_v24 = vadd.f32 %v1237_v23, %v639_v21  ;;  %v722_v25 = vadd.f32 %v1238_v20, %v721_v22 }
 0x1ee   : > { %v726_v28 = vpack.c.bf16 %v640_v24, %v640_v24  ;;  %v760_v29 = vpack.c.bf16 %v722_v25, %v722_v25 }
 0x1f0   : > { %v730_v34 = vunpack.c.l.b16 %v726_v28  ;;  %v764_v35 = vunpack.c.l.b16 %v760_v29 }
 0x1f3   : > { %v641_v26 = vpop.f32.mrf.mxu0  ;;  %v723_v27 = vpop.f32.mrf.mxu1 }
 0x1f4   : > { %v642_v30 = vadd.f32 %v1237_v23, %v641_v26  ;;  %v724_v31 = vadd.f32 %v1238_v20, %v723_v27 }
 0x1f6   : > { %v727_v32 = vpack.c.bf16 %v642_v30, %v642_v30  ;;  %v761_v33 = vpack.c.bf16 %v724_v31, %v724_v31 }
 0x1f8   : > { %v731_v36 = vunpack.c.l.b16 %v727_v32  ;;  %v765_v37 = vunpack.c.l.b16 %v761_v33 }
 0x1fa   : > { %v732_v38 = vpack.c.b16 %v731_v36, %v730_v34  ;;  %v766_v39 = vpack.c.b16 %v765_v37, %v764_v35 }
 0x1fc   : > { %741 = vmatpush.bf16.xpose.msra.mxu2 %v732_v38 }
 0x203   : > { %742 = vmatmul.bf16.vlgmr.msra.gmra.mxu2 %v507_v40 }
 0x204   : > { %778 = vmatpush.bf16.msrb.mxu2 %v766_v39 }
 0x286   : > { %v743_v41 = vpop.f32.mrf.mxu2 }
 0x287   : > { %v748_v42 = vsel %vm747_vm10, %v743_v41, -inf }
 0x288   : > { %749 = vmax.xlane.f32.xlu0 %v748_v42 }
 0x28e   : > { %v745_v43 = vpop.f32.mrf.mxu2 }
 0x2fb   : > { %v750_v44 = vpop.xlane.xlu0 %749 }
 0x2fc   : > { %v751_v45 = vsub.f32 %v743_v41, %v750_v44 }
 0x2fe   : > { %v752_v46 = vmul.f32 1.442695, %v751_v45 }
 0x300   : > { %1248 = vpow2.f32 %v752_v46 }
 0x306   : > { %v1249_v47 = vpop.eup %1248 }
 0x307   : > { %v754_v48 = vsel %vm747_vm10, %v1249_v47, 0.0 }
 0x308   : > { %755 = vadd.xlane.f32.xlu1 %v754_v48 }
 0x37b   : > { %v756_v55 = vpop.xlane.xlu1 %755 }
 0x37c   : > { %1250 = vrcp.f32 %v756_v55 }
 0x382   : > { %v1251_v57 = vpop.eup %1250 }
 0x383   : > { %v758_v58 = vmul.f32 %v1251_v57, %v1249_v47 }
 0x385   : > { %v759_v59 = vpack.c.bf16 %v758_v58, %v758_v58 }
 0x387   : > { %1086 = vmatmul.msk.bf16.vlgmr.msrb.gmra.mxu2 %vm747_vm10, %v759_v59 }
 0x40a   : > { %v780_v61 = vpop.f32.mrf.mxu2 }
 0x40b   : > { %v784_v62 = vpack.c.bf16 %v780_v61, %v780_v61 }
 0x40d   : > { %861 = vmatmul.bf16.vlgmr.msra.gmra.mxu3 %v784_v62 }
 0x412   : > { %v782_v63 = vpop.f32.mrf.mxu2 }
 0x490   : > { %v862_v1 = vpop.f32.mrf.mxu3 }
 0x491   : > { %v863_v2 = vadd.f32 %v1239_v0, %v862_v1 }
 0x493   : > { %866 = vst [vmem:[%s467_s28] sm:$0xff] %v863_v2 }
 0x494   : > { %1429 = shalt.err (!%p1426_p5)
}
 0x495   : > { %1164 = dma.vmem_to_hbm [thread:$0]  (%p1625_p0), %s881_s25, 128, %s883_s4, %s868_s27  }
 0x498   : > { %v864_v3 = vpop.f32.mrf.mxu3 }
 0x499 PF: > { %s1808_s8 = sld [smem:[#allocation17_spill]]  ;;  %p1810_p10 = scmp.ge.s32.totalorder %s1480_s16, 2 }
 0x49b   : > { %p1184_p11 = pnand %p1810_p10, %p1633_p6 }
 0x49d   : > { %p1185_p12 = pneg %p1184_p11 }
 0x49f   : > { %s894_s12 = sand.u32 1, %s1808_s8  }
 0x4a0   : > { %s895_s19 = scalar_lea.sflag [#allocation4], %s894_s12 }
 0x4a1   : > { %1463 = dma.done.wait (%p1185_p12), %s895_s19, 128  }
 0x4a2   : > { %1465 = vsyncadd (%p1185_p12), %s895_s19, 4294967168  ;;  %s1811_s16 = sld [smem:[#allocation19_spill]]  ;;  %s1814_s13 = smov %s1472_s14 }
 0x4a3   : > { %s1812_s23 = sld [smem:[#allocation18_spill]] }
 0x4a4   : > { %s1813_s15 = sld [smem:[#allocation20_spill]] }
 0x4a8   : > { %p27_p2 = scmp.ge.s32.totalorder %s1811_s16, 4  }
 0x4a9   : > { %s1815_s14 = smov %s1812_s23 }
 0x4aa   :  { %29 = sbr.rel (!%p27_p2) target bundleno = 12 (0xc), region = 130 }
 0x4af   :  { %901 = vsyncpa [#allocation3], 1 }
 0x4b0   :  { %903 = vsyncpa [#allocation3 + $0x1], 1 }
 0x4b1   :  { %904 = vsyncpa [#allocation6], 1 }
 0x4b2   :  { %906 = vsyncpa [#allocation6 + $0x1], 1 }
 0x4b3   :  { %907 = vsyncpa [#allocation9], 1 }
 0x4b4   :  { %908 = vsyncpa [#allocation4], 1 }
 0x4b5   :  { %910 = vsyncpa [#allocation4 + $0x1], 1 }

</bundles_post_ra>
